<compile_context>
chip_gen: v5e
topology: v5e:2x2
jax: 0.10.0
libtpu: 0.0.40
codegen_flags: <defaults>
</compile_context>

<pallas_src>
import jax
import jax.numpy as jnp
import numpy as np
from jax.experimental import pallas as pl

# ---- problem sizes (small, consistent with the module) ----
B, S, E = 2, 8, 32          # batch, seq, dim_embed
NH = 4                      # attention heads
HD = E // NH                # head dim
FF = 4 * E                  # feed-forward hidden dim
EPS = 1e-5                  # nn.LayerNorm default eps

BS = B * S                  # 16  (flattened batch*seq rows)
G = NH * B                  # 8   (head x batch groups)
GS = G * S                  # 64  (head-stacked rows)
NEG = -1e30                 # finite "-inf" for the block mask


def _layer_norm(z, g, b):
    mu = jnp.mean(z, axis=-1, keepdims=True)
    var = jnp.mean((z - mu) ** 2, axis=-1, keepdims=True)
    return (z - mu) * jax.lax.rsqrt(var + EPS) * g + b


def encoder_layer_kernel(x_ref,
                         ln1_g_ref, ln1_b_ref,
                         w_in_ref, b_in_ref,
                         w_out_ref, b_out_ref,
                         ln2_g_ref, ln2_b_ref,
                         w1_ref, b1_ref,
                         w2_ref, b2_ref,
                         mask_ref, sel_ref,
                         out_ref, attn_ref):
    x = x_ref[...]                                             # (BS, E) f32

    # ---------------- attention sublayer: x = x + MHA(LN(x)) ----------------
    y = _layer_norm(x, ln1_g_ref[...], ln1_b_ref[...])

    # Fused QKV projection; columns pre-permuted per head, scale pre-folded.
    qkv = jnp.dot(y.astype(jnp.bfloat16), w_in_ref[...],
                  preferred_element_type=jnp.float32) + b_in_ref[...]      # (BS, 3E)

    # Head-stack, rows ordered (head, batch, seq): 4 lane-slices + 1 concat.
    qkv_st = jnp.concatenate(
        [qkv[:, h * 3 * HD:(h + 1) * 3 * HD] for h in range(NH)], axis=0)  # (GS, 3HD)
    q_st = qkv_st[:, :HD].astype(jnp.bfloat16)
    k_st = qkv_st[:, HD:2 * HD].astype(jnp.bfloat16)
    v_st = qkv_st[:, 2 * HD:].astype(jnp.bfloat16)

    # ONE score matmul for all heads/batches + constant additive block mask.
    s = jax.lax.dot_general(q_st, k_st, (((1,), (1,)), ((), ())),
                            preferred_element_type=jnp.float32)            # (GS, GS)
    s = s + mask_ref[...]

    # ONE softmax pass; approx reciprocal runs on the EUP slot.
    m = jnp.max(s, axis=-1, keepdims=True)
    p = jnp.exp(s - m)
    p = p * pl.reciprocal(jnp.sum(p, axis=-1, keepdims=True), approx=True)
    p_bf = p.astype(jnp.bfloat16)

    # ONE P @ V for all heads/batches.
    o_st = jnp.dot(p_bf, v_st, preferred_element_type=jnp.float32)         # (GS, HD)

    # Head-averaged attention weights: p is exactly block-diagonal (masked
    # entries are exactly 0), so one selection matmul folds every group's S
    # columns onto 0..S-1; then a 4-way sublane block sum averages heads.
    q_sel = jnp.dot(p_bf, sel_ref[...],
                    preferred_element_type=jnp.float32)                    # (GS, S)
    attn_ref[...] = (q_sel[0:BS] + q_sel[BS:2 * BS]
                     + q_sel[2 * BS:3 * BS] + q_sel[3 * BS:]) * (1.0 / NH)

    # Single bf16 output projection on the reassembled (BS, E) slab.
    attn_cat = jnp.concatenate(
        [o_st[h * BS:(h + 1) * BS, :] for h in range(NH)], axis=1)         # (BS, E)
    attn_out = jnp.dot(attn_cat.astype(jnp.bfloat16), w_out_ref[...],
                       preferred_element_type=jnp.float32) + b_out_ref[...]

    # TODO(synk): dropout is a no-op here (eval mode); masks are None at call site.
    x1 = x + attn_out

    # ---------------- feed-forward sublayer: x = x + FFN(LN(x)) -------------
    y2 = _layer_norm(x1, ln2_g_ref[...], ln2_b_ref[...])
    h1 = jnp.maximum(
        jnp.dot(y2.astype(jnp.bfloat16), w1_ref[...],
                preferred_element_type=jnp.float32) + b1_ref[...], 0.0)
    h2 = jnp.dot(h1.astype(jnp.bfloat16), w2_ref[...],
                 preferred_element_type=jnp.float32) + b2_ref[...]
    out_ref[...] = x1 + h2


def prepare_params(params):
    """One-time (eager) weight prep: fold the 1/sqrt(HD) softmax scale into the
    q projection, permute QKV columns per head, cast MXU operands to bf16, and
    build the constant block mask / selection matrices."""
    (ln1_g, ln1_b, w_in_t, b_in, w_out_t, b_out,
     ln2_g, ln2_b, w1_t, b1, w2_t, b2) = params

    scale = 1.0 / (HD ** 0.5)
    scale_vec = np.concatenate([np.full(E, scale, np.float32),
                                np.ones(2 * E, np.float32)])[None, :]       # scale q only
    perm = np.concatenate(
        [np.concatenate([np.arange(h * HD, (h + 1) * HD) + j * E for j in range(3)])
         for h in range(NH)])                                               # per-head [q|k|v]

    w_in_p = jnp.asarray((w_in_t * scale_vec)[:, perm], dtype=jnp.bfloat16)
    b_in_p = jnp.asarray((b_in * scale_vec)[:, perm], dtype=jnp.float32)

    # Block-diagonal additive mask over (head, batch) groups of S rows.
    gid = np.arange(GS) // S
    mask_bias = jnp.asarray(
        np.where(gid[:, None] == gid[None, :], 0.0, NEG).astype(np.float32))
    # Selection matrix folding every group's S columns onto columns 0..S-1.
    sel_r = jnp.asarray(np.tile(np.eye(S, dtype=np.float32), (G, 1)),
                        dtype=jnp.bfloat16)

    return (ln1_g, ln1_b, w_in_p, b_in_p,
            jnp.asarray(w_out_t, dtype=jnp.bfloat16), b_out,
            ln2_g, ln2_b,
            jnp.asarray(w1_t, dtype=jnp.bfloat16), b1,
            jnp.asarray(w2_t, dtype=jnp.bfloat16), b2,
            mask_bias, sel_r)


def encoder_layer(x, prepped):
    """x: (B, S, E) f32.  Returns (out (B,S,E), attn_weights (B,S,S))."""
    x2d = x.reshape(BS, E)
    # Single invocation, no grid: everything (inputs + outputs, <100 KiB)
    # lives in VMEM directly with no pipeline double-buffering.
    out2d, attn_flat = pl.pallas_call(
        encoder_layer_kernel,
        out_shape=(jax.ShapeDtypeStruct((BS, E), jnp.float32),
                   jax.ShapeDtypeStruct((BS, S), jnp.float32)),
    )(x2d, *prepped)
    return out2d.reshape(B, S, E), attn_flat.reshape(B, S, S)


def make_params(key):
    ks = jax.random.split(key, 8)
    scale = 0.1
    ln1_g = jnp.ones((1, E), jnp.float32)
    ln1_b = jnp.zeros((1, E), jnp.float32)
    w_in_t = scale * jax.random.normal(ks[0], (E, 3 * E), jnp.float32)   # W_in.T
    b_in = scale * jax.random.normal(ks[1], (1, 3 * E), jnp.float32)
    w_out_t = scale * jax.random.normal(ks[2], (E, E), jnp.float32)      # W_out.T
    b_out = scale * jax.random.normal(ks[3], (1, E), jnp.float32)
    ln2_g = jnp.ones((1, E), jnp.float32)
    ln2_b = jnp.zeros((1, E), jnp.float32)
    w1_t = scale * jax.random.normal(ks[4], (E, FF), jnp.float32)        # W1.T
    b1 = scale * jax.random.normal(ks[5], (1, FF), jnp.float32)
    w2_t = scale * jax.random.normal(ks[6], (FF, E), jnp.float32)        # W2.T
    b2 = scale * jax.random.normal(ks[7], (1, E), jnp.float32)
    return (ln1_g, ln1_b, w_in_t, b_in, w_out_t, b_out,
            ln2_g, ln2_b, w1_t, b1, w2_t, b2)


def reference(x, params):
    (ln1_g, ln1_b, w_in_t, b_in, w_out_t, b_out,
     ln2_g, ln2_b, w1_t, b1, w2_t, b2) = params

    def ln(z, g, b):
        mu = z.mean(-1, keepdims=True)
        var = ((z - mu) ** 2).mean(-1, keepdims=True)
        return (z - mu) / jnp.sqrt(var + EPS) * g + b

    y = ln(x, ln1_g, ln1_b)
    qkv = y @ w_in_t + b_in
    q, k, v = qkv[..., :E], qkv[..., E:2 * E], qkv[..., 2 * E:]
    qh = q.reshape(B, S, NH, HD).transpose(0, 2, 1, 3)
    kh = k.reshape(B, S, NH, HD).transpose(0, 2, 1, 3)
    vh = v.reshape(B, S, NH, HD).transpose(0, 2, 1, 3)
    sc = jnp.einsum('bhqd,bhkd->bhqk', qh, kh) / jnp.sqrt(HD)
    p = jax.nn.softmax(sc, axis=-1)
    o = jnp.einsum('bhqk,bhkd->bhqd', p, vh).transpose(0, 2, 1, 3).reshape(B, S, E)
    x1 = x + (o @ w_out_t + b_out)
    y2 = ln(x1, ln2_g, ln2_b)
    out = x1 + (jnp.maximum(y2 @ w1_t + b1, 0.0) @ w2_t + b2)
    return out, p.mean(axis=1)


if __name__ == "__main__":
    key = jax.random.PRNGKey(0)
    kx, kp = jax.random.split(key)
    x = jax.random.normal(kx, (B, S, E), jnp.float32)
    params = make_params(kp)
    prepped = prepare_params(params)          # one-time eager weight prep

    out, attn_w = jax.jit(encoder_layer)(x, prepped)
    out = jax.block_until_ready(out)
    attn_w = jax.block_until_ready(attn_w)

    ref_out, ref_attn = reference(x, params)
    assert out.shape == (B, S, E) and attn_w.shape == (B, S, S)
    assert jnp.allclose(out, ref_out, atol=1e-2, rtol=1e-2)
    assert jnp.allclose(attn_w, ref_attn, atol=1e-2, rtol=1e-2)

    print("KERNEL_OK")
</pallas_src>

<mosaic_0001>
module attributes {stable_mosaic.version = 11 : i64} {
  func.func @encoder_layer_kernel(%arg0: memref<16x32xf32, #tpu.memory_space<vmem>>, %arg1: memref<1x32xf32, #tpu.memory_space<vmem>>, %arg2: memref<1x32xf32, #tpu.memory_space<vmem>>, %arg3: memref<32x96xbf16, #tpu.memory_space<vmem>>, %arg4: memref<1x96xf32, #tpu.memory_space<vmem>>, %arg5: memref<32x32xbf16, #tpu.memory_space<vmem>>, %arg6: memref<1x32xf32, #tpu.memory_space<vmem>>, %arg7: memref<1x32xf32, #tpu.memory_space<vmem>>, %arg8: memref<1x32xf32, #tpu.memory_space<vmem>>, %arg9: memref<32x128xbf16, #tpu.memory_space<vmem>>, %arg10: memref<1x128xf32, #tpu.memory_space<vmem>>, %arg11: memref<128x32xbf16, #tpu.memory_space<vmem>>, %arg12: memref<1x32xf32, #tpu.memory_space<vmem>>, %arg13: memref<64x64xf32, #tpu.memory_space<vmem>>, %arg14: memref<64x8xbf16, #tpu.memory_space<vmem>>, %arg15: memref<16x32xf32, #tpu.memory_space<vmem>>, %arg16: memref<16x8xf32, #tpu.memory_space<vmem>>) attributes {dimension_semantics = [], scalar_prefetch = 0 : i64, scratch_operands = 0 : i64, tpu.core_type = #tpu.core_type<tc>} {
    %c0 = arith.constant 0 : index
    %c0_0 = arith.constant 0 : index
    %0 = vector.load %arg0[%c0, %c0_0] : memref<16x32xf32, #tpu.memory_space<vmem>>, vector<16x32xf32>
    %c0_1 = arith.constant 0 : index
    %c0_2 = arith.constant 0 : index
    %1 = vector.load %arg1[%c0_1, %c0_2] : memref<1x32xf32, #tpu.memory_space<vmem>>, vector<1x32xf32>
    %c0_3 = arith.constant 0 : index
    %c0_4 = arith.constant 0 : index
    %2 = vector.load %arg2[%c0_3, %c0_4] : memref<1x32xf32, #tpu.memory_space<vmem>>, vector<1x32xf32>
    %cst = arith.constant dense<0.000000e+00> : vector<16xf32>
    %3 = vector.multi_reduction <add>, %0, %cst [1] : vector<16x32xf32> to vector<16xf32>
    %4 = vector.shape_cast %3 : vector<16xf32> to vector<16x1xf32>
    %cst_5 = arith.constant 3.200000e+01 : f32
    %5 = vector.broadcast %cst_5 : f32 to vector<16x1xf32>
    %6 = arith.divf %4, %5 : vector<16x1xf32>
    %7 = vector.broadcast %6 : vector<16x1xf32> to vector<16x32xf32>
    %8 = arith.subf %0, %7 : vector<16x32xf32>
    %9 = arith.mulf %8, %8 : vector<16x32xf32>
    %cst_6 = arith.constant dense<0.000000e+00> : vector<16xf32>
    %10 = vector.multi_reduction <add>, %9, %cst_6 [1] : vector<16x32xf32> to vector<16xf32>
    %11 = vector.shape_cast %10 : vector<16xf32> to vector<16x1xf32>
    %cst_7 = arith.constant 3.200000e+01 : f32
    %12 = vector.broadcast %cst_7 : f32 to vector<16x1xf32>
    %13 = arith.divf %11, %12 : vector<16x1xf32>
    %14 = vector.broadcast %6 : vector<16x1xf32> to vector<16x32xf32>
    %15 = arith.subf %0, %14 : vector<16x32xf32>
    %cst_8 = arith.constant 9.99999974E-6 : f32
    %16 = vector.broadcast %cst_8 : f32 to vector<16x1xf32>
    %17 = arith.addf %13, %16 : vector<16x1xf32>
    %18 = math.rsqrt %17 : vector<16x1xf32>
    %19 = vector.broadcast %18 : vector<16x1xf32> to vector<16x32xf32>
    %20 = arith.mulf %15, %19 : vector<16x32xf32>
    %21 = vector.broadcast %1 : vector<1x32xf32> to vector<16x32xf32>
    %22 = arith.mulf %20, %21 : vector<16x32xf32>
    %23 = vector.broadcast %2 : vector<1x32xf32> to vector<16x32xf32>
    %24 = arith.addf %22, %23 : vector<16x32xf32>
    %25 = arith.truncf %24 : vector<16x32xf32> to vector<16x32xbf16>
    %c0_9 = arith.constant 0 : index
    %c0_10 = arith.constant 0 : index
    %26 = vector.load %arg3[%c0_9, %c0_10] : memref<32x96xbf16, #tpu.memory_space<vmem>>, vector<32x96xbf16>
    %cst_11 = arith.constant dense<0.000000e+00> : vector<16x96xf32>
    %27 = tpu.matmul %25, %26, %cst_11 {dimension_numbers = #tpu.dot_dimension_numbers<[1], [0], [0], [1], [0, 0, 1, 1], [], []>} : vector<16x32xbf16>, vector<32x96xbf16>, vector<16x96xf32> -> vector<16x96xf32>
    %c0_12 = arith.constant 0 : index
    %c0_13 = arith.constant 0 : index
    %28 = vector.load %arg4[%c0_12, %c0_13] : memref<1x96xf32, #tpu.memory_space<vmem>>, vector<1x96xf32>
    %29 = vector.broadcast %28 : vector<1x96xf32> to vector<16x96xf32>
    %30 = arith.addf %27, %29 : vector<16x96xf32>
    %31 = vector.extract_strided_slice %30 {offsets = [0, 0], sizes = [16, 24], strides = [1, 1]} : vector<16x96xf32> to vector<16x24xf32>
    %32 = vector.extract_strided_slice %30 {offsets = [0, 24], sizes = [16, 24], strides = [1, 1]} : vector<16x96xf32> to vector<16x24xf32>
    %33 = vector.extract_strided_slice %30 {offsets = [0, 48], sizes = [16, 24], strides = [1, 1]} : vector<16x96xf32> to vector<16x24xf32>
    %34 = vector.extract_strided_slice %30 {offsets = [0, 72], sizes = [16, 24], strides = [1, 1]} : vector<16x96xf32> to vector<16x24xf32>
    %35 = tpu.concatenate %31, %32, %33, %34 in 0 : vector<16x24xf32>, vector<16x24xf32>, vector<16x24xf32>, vector<16x24xf32> -> vector<64x24xf32>
    %36 = vector.extract_strided_slice %35 {offsets = [0, 0], sizes = [64, 8], strides = [1, 1]} : vector<64x24xf32> to vector<64x8xf32>
    %37 = arith.truncf %36 : vector<64x8xf32> to vector<64x8xbf16>
    %38 = vector.extract_strided_slice %35 {offsets = [0, 8], sizes = [64, 8], strides = [1, 1]} : vector<64x24xf32> to vector<64x8xf32>
    %39 = arith.truncf %38 : vector<64x8xf32> to vector<64x8xbf16>
    %40 = vector.extract_strided_slice %35 {offsets = [0, 16], sizes = [64, 8], strides = [1, 1]} : vector<64x24xf32> to vector<64x8xf32>
    %41 = arith.truncf %40 : vector<64x8xf32> to vector<64x8xbf16>
    %cst_14 = arith.constant dense<0.000000e+00> : vector<64x64xf32>
    %42 = tpu.matmul %37, %39, %cst_14 {dimension_numbers = #tpu.dot_dimension_numbers<[1], [1], [0], [0], [0, 0, 1, 0], [], []>} : vector<64x8xbf16>, vector<64x8xbf16>, vector<64x64xf32> -> vector<64x64xf32>
    %c0_15 = arith.constant 0 : index
    %c0_16 = arith.constant 0 : index
    %43 = vector.load %arg13[%c0_15, %c0_16] : memref<64x64xf32, #tpu.memory_space<vmem>>, vector<64x64xf32>
    %44 = arith.addf %42, %43 : vector<64x64xf32>
    %cst_17 = arith.constant dense<0xFF800000> : vector<64xf32>
    %45 = vector.multi_reduction <maximumf>, %44, %cst_17 [1] : vector<64x64xf32> to vector<64xf32>
    %46 = vector.shape_cast %45 : vector<64xf32> to vector<64x1xf32>
    %47 = vector.broadcast %46 : vector<64x1xf32> to vector<64x64xf32>
    %48 = arith.subf %44, %47 : vector<64x64xf32>
    %49 = math.exp %48 : vector<64x64xf32>
    %cst_18 = arith.constant dense<0.000000e+00> : vector<64xf32>
    %50 = vector.multi_reduction <add>, %49, %cst_18 [1] : vector<64x64xf32> to vector<64xf32>
    %51 = vector.shape_cast %50 : vector<64xf32> to vector<64x1xf32>
    %52 = tpu.reciprocal %51 {approx = true} : vector<64x1xf32> -> vector<64x1xf32>
    %53 = vector.broadcast %52 : vector<64x1xf32> to vector<64x64xf32>
    %54 = arith.mulf %49, %53 : vector<64x64xf32>
    %55 = arith.truncf %54 : vector<64x64xf32> to vector<64x64xbf16>
    %cst_19 = arith.constant dense<0.000000e+00> : vector<64x8xf32>
    %56 = tpu.matmul %55, %41, %cst_19 {dimension_numbers = #tpu.dot_dimension_numbers<[1], [0], [0], [1], [0, 0, 1, 1], [], []>} : vector<64x64xbf16>, vector<64x8xbf16>, vector<64x8xf32> -> vector<64x8xf32>
    %c0_20 = arith.constant 0 : index
    %c0_21 = arith.constant 0 : index
    %57 = vector.load %arg14[%c0_20, %c0_21] : memref<64x8xbf16, #tpu.memory_space<vmem>>, vector<64x8xbf16>
    %cst_22 = arith.constant dense<0.000000e+00> : vector<64x8xf32>
    %58 = tpu.matmul %55, %57, %cst_22 {dimension_numbers = #tpu.dot_dimension_numbers<[1], [0], [0], [1], [0, 0, 1, 1], [], []>} : vector<64x64xbf16>, vector<64x8xbf16>, vector<64x8xf32> -> vector<64x8xf32>
    %59 = vector.extract_strided_slice %58 {offsets = [0, 0], sizes = [16, 8], strides = [1, 1]} : vector<64x8xf32> to vector<16x8xf32>
    %60 = vector.extract_strided_slice %58 {offsets = [16, 0], sizes = [16, 8], strides = [1, 1]} : vector<64x8xf32> to vector<16x8xf32>
    %61 = arith.addf %59, %60 : vector<16x8xf32>
    %62 = vector.extract_strided_slice %58 {offsets = [32, 0], sizes = [16, 8], strides = [1, 1]} : vector<64x8xf32> to vector<16x8xf32>
    %63 = arith.addf %61, %62 : vector<16x8xf32>
    %64 = vector.extract_strided_slice %58 {offsets = [48, 0], sizes = [16, 8], strides = [1, 1]} : vector<64x8xf32> to vector<16x8xf32>
    %65 = arith.addf %63, %64 : vector<16x8xf32>
    %cst_23 = arith.constant 2.500000e-01 : f32
    %66 = vector.broadcast %cst_23 : f32 to vector<16x8xf32>
    %67 = arith.mulf %65, %66 : vector<16x8xf32>
    %c0_24 = arith.constant 0 : index
    %c0_25 = arith.constant 0 : index
    %68 = vector.load %arg16[%c0_24, %c0_25] : memref<16x8xf32, #tpu.memory_space<vmem>>, vector<16x8xf32>
    tpu.vector_store %arg16[%c0_24, %c0_25], %67 {strides = array<i32>} : memref<16x8xf32, #tpu.memory_space<vmem>>, vector<16x8xf32>,
    %69 = vector.extract_strided_slice %56 {offsets = [0, 0], sizes = [16, 8], strides = [1, 1]} : vector<64x8xf32> to vector<16x8xf32>
    %70 = vector.extract_strided_slice %56 {offsets = [16, 0], sizes = [16, 8], strides = [1, 1]} : vector<64x8xf32> to vector<16x8xf32>
    %71 = vector.extract_strided_slice %56 {offsets = [32, 0], sizes = [16, 8], strides = [1, 1]} : vector<64x8xf32> to vector<16x8xf32>
    %72 = vector.extract_strided_slice %56 {offsets = [48, 0], sizes = [16, 8], strides = [1, 1]} : vector<64x8xf32> to vector<16x8xf32>
    %73 = tpu.concatenate %69, %70, %71, %72 in 1 : vector<16x8xf32>, vector<16x8xf32>, vector<16x8xf32>, vector<16x8xf32> -> vector<16x32xf32>
    %74 = arith.truncf %73 : vector<16x32xf32> to vector<16x32xbf16>
    %c0_26 = arith.constant 0 : index
    %c0_27 = arith.constant 0 : index
    %75 = vector.load %arg5[%c0_26, %c0_27] : memref<32x32xbf16, #tpu.memory_space<vmem>>, vector<32x32xbf16>
    %cst_28 = arith.constant dense<0.000000e+00> : vector<16x32xf32>
    %76 = tpu.matmul %74, %75, %cst_28 {dimension_numbers = #tpu.dot_dimension_numbers<[1], [0], [0], [1], [0, 0, 1, 1], [], []>} : vector<16x32xbf16>, vector<32x32xbf16>, vector<16x32xf32> -> vector<16x32xf32>
    %c0_29 = arith.constant 0 : index
    %c0_30 = arith.constant 0 : index
    %77 = vector.load %arg6[%c0_29, %c0_30] : memref<1x32xf32, #tpu.memory_space<vmem>>, vector<1x32xf32>
    %78 = vector.broadcast %77 : vector<1x32xf32> to vector<16x32xf32>
    %79 = arith.addf %76, %78 : vector<16x32xf32>
    %80 = arith.addf %0, %79 : vector<16x32xf32>
    %c0_31 = arith.constant 0 : index
    %c0_32 = arith.constant 0 : index
    %81 = vector.load %arg7[%c0_31, %c0_32] : memref<1x32xf32, #tpu.memory_space<vmem>>, vector<1x32xf32>
    %c0_33 = arith.constant 0 : index
    %c0_34 = arith.constant 0 : index
    %82 = vector.load %arg8[%c0_33, %c0_34] : memref<1x32xf32, #tpu.memory_space<vmem>>, vector<1x32xf32>
    %cst_35 = arith.constant dense<0.000000e+00> : vector<16xf32>
    %83 = vector.multi_reduction <add>, %80, %cst_35 [1] : vector<16x32xf32> to vector<16xf32>
    %84 = vector.shape_cast %83 : vector<16xf32> to vector<16x1xf32>
    %cst_36 = arith.constant 3.200000e+01 : f32
    %85 = vector.broadcast %cst_36 : f32 to vector<16x1xf32>
    %86 = arith.divf %84, %85 : vector<16x1xf32>
    %87 = vector.broadcast %86 : vector<16x1xf32> to vector<16x32xf32>
    %88 = arith.subf %80, %87 : vector<16x32xf32>
    %89 = arith.mulf %88, %88 : vector<16x32xf32>
    %cst_37 = arith.constant dense<0.000000e+00> : vector<16xf32>
    %90 = vector.multi_reduction <add>, %89, %cst_37 [1] : vector<16x32xf32> to vector<16xf32>
    %91 = vector.shape_cast %90 : vector<16xf32> to vector<16x1xf32>
    %cst_38 = arith.constant 3.200000e+01 : f32
    %92 = vector.broadcast %cst_38 : f32 to vector<16x1xf32>
    %93 = arith.divf %91, %92 : vector<16x1xf32>
    %94 = vector.broadcast %86 : vector<16x1xf32> to vector<16x32xf32>
    %95 = arith.subf %80, %94 : vector<16x32xf32>
    %cst_39 = arith.constant 9.99999974E-6 : f32
    %96 = vector.broadcast %cst_39 : f32 to vector<16x1xf32>
    %97 = arith.addf %93, %96 : vector<16x1xf32>
    %98 = math.rsqrt %97 : vector<16x1xf32>
    %99 = vector.broadcast %98 : vector<16x1xf32> to vector<16x32xf32>
    %100 = arith.mulf %95, %99 : vector<16x32xf32>
    %101 = vector.broadcast %81 : vector<1x32xf32> to vector<16x32xf32>
    %102 = arith.mulf %100, %101 : vector<16x32xf32>
    %103 = vector.broadcast %82 : vector<1x32xf32> to vector<16x32xf32>
    %104 = arith.addf %102, %103 : vector<16x32xf32>
    %105 = arith.truncf %104 : vector<16x32xf32> to vector<16x32xbf16>
    %c0_40 = arith.constant 0 : index
    %c0_41 = arith.constant 0 : index
    %106 = vector.load %arg9[%c0_40, %c0_41] : memref<32x128xbf16, #tpu.memory_space<vmem>>, vector<32x128xbf16>
    %cst_42 = arith.constant dense<0.000000e+00> : vector<16x128xf32>
    %107 = tpu.matmul %105, %106, %cst_42 {dimension_numbers = #tpu.dot_dimension_numbers<[1], [0], [0], [1], [0, 0, 1, 1], [], []>} : vector<16x32xbf16>, vector<32x128xbf16>, vector<16x128xf32> -> vector<16x128xf32>
    %c0_43 = arith.constant 0 : index
    %c0_44 = arith.constant 0 : index
    %108 = vector.load %arg10[%c0_43, %c0_44] : memref<1x128xf32, #tpu.memory_space<vmem>>, vector<1x128xf32>
    %109 = vector.broadcast %108 : vector<1x128xf32> to vector<16x128xf32>
    %110 = arith.addf %107, %109 : vector<16x128xf32>
    %cst_45 = arith.constant 0.000000e+00 : f32
    %111 = vector.broadcast %cst_45 : f32 to vector<16x128xf32>
    %112 = arith.maximumf %110, %111 : vector<16x128xf32>
    %113 = arith.truncf %112 : vector<16x128xf32> to vector<16x128xbf16>
    %c0_46 = arith.constant 0 : index
    %c0_47 = arith.constant 0 : index
    %114 = vector.load %arg11[%c0_46, %c0_47] : memref<128x32xbf16, #tpu.memory_space<vmem>>, vector<128x32xbf16>
    %cst_48 = arith.constant dense<0.000000e+00> : vector<16x32xf32>
    %115 = tpu.matmul %113, %114, %cst_48 {dimension_numbers = #tpu.dot_dimension_numbers<[1], [0], [0], [1], [0, 0, 1, 1], [], []>} : vector<16x128xbf16>, vector<128x32xbf16>, vector<16x32xf32> -> vector<16x32xf32>
    %c0_49 = arith.constant 0 : index
    %c0_50 = arith.constant 0 : index
    %116 = vector.load %arg12[%c0_49, %c0_50] : memref<1x32xf32, #tpu.memory_space<vmem>>, vector<1x32xf32>
    %117 = vector.broadcast %116 : vector<1x32xf32> to vector<16x32xf32>
    %118 = arith.addf %115, %117 : vector<16x32xf32>
    %119 = arith.addf %80, %118 : vector<16x32xf32>
    %c0_51 = arith.constant 0 : index
    %c0_52 = arith.constant 0 : index
    %120 = vector.load %arg15[%c0_51, %c0_52] : memref<16x32xf32, #tpu.memory_space<vmem>>, vector<16x32xf32>
    tpu.vector_store %arg15[%c0_51, %c0_52], %119 {strides = array<i32>} : memref<16x32xf32, #tpu.memory_space<vmem>>, vector<16x32xf32>,
    return
  }
}

</mosaic_0001>

<bundles_post_ra>
// kernel: encoder_layer.1
= control target key start
LH: loop header
LB: loop body
LE: loop exit
PB: predicated region body
PF: predicated region fallthrough
CT: control target
= control target key end

     0   :  { %s1426_s0 = inlined_call_operand.vmem [shape: f32[16,32], index: 0, kind: input, shape index: {}]   ;;  %s1427_s1 = inlined_call_operand.vmem [shape: f32[1,32], index: 1, kind: input, shape index: {}]   ;;  %s1428_s2 = inlined_call_operand.vmem [shape: f32[1,32], index: 2, kind: input, shape index: {}]   ;;  %s1429_s3 = inlined_call_operand.vmem [shape: bf16[32,96], index: 3, kind: input, shape index: {}]   ;;  %s1430_s4 = inlined_call_operand.vmem [shape: f32[1,96], index: 4, kind: input, shape index: {}]   ;;  %s1431_s5 = inlined_call_operand.hbm [shape: bf16[32,32], index: 5, kind: input, shape index: {}]   ;;  %s1432_s6 = inlined_call_operand.vmem [shape: f32[1,32], index: 6, kind: input, shape index: {}]   ;;  %s1433_s7 = inlined_call_operand.vmem [shape: f32[1,32], index: 7, kind: input, shape index: {}]   ;;  %s1434_s8 = inlined_call_operand.vmem [shape: f32[1,32], index: 8, kind: input, shape index: {}]   ;;  %s1435_s9 = inlined_call_operand.hbm [shape: bf16[32,128], index: 9, kind: input, shape index: {}]   ;;  %s1436_s10 = inlined_call_operand.vmem [shape: f32[1,128], index: 10, kind: input, shape index: {}]   ;;  %s1437_s11 = inlined_call_operand.vmem [shape: bf16[128,32], index: 11, kind: input, shape index: {}]   ;;  %s1438_s12 = inlined_call_operand.vmem [shape: f32[1,32], index: 12, kind: input, shape index: {}]   ;;  %s1439_s13 = inlined_call_operand.vmem [shape: f32[64,64], index: 13, kind: input, shape index: {}]   ;;  %s1440_s14 = inlined_call_operand.vmem [shape: bf16[64,8], index: 14, kind: input, shape index: {}]   ;;  %s1441_s15 = inlined_call_operand.hbm [shape: f32[16,32], index: 15, kind: output, shape index: {0}]   ;;  %s1442_s16 = inlined_call_operand.hbm [shape: f32[16,8], index: 16, kind: output, shape index: {1}]  }
   0x1   :  { %1444 = sst [smem:[#allocation14_spill]] %s1426_s0 }
   0x2   :  { %22 = vsyncpa [#allocation3], 0 }
   0x3   :  { %23 = vsyncpa [#allocation6], 0 }
   0x4   :  { %24 = vsyncpa [#allocation4], 0 }
   0x5   :  { %25 = vsyncpa [#allocation9], 0  ;;  %s40_s23 = sshll.u32 %s1431_s5, 4  ;;  %s1104_s24 = smov [#allocation2]   ;;  %s41_s23 = int_to_ptr.hbm [resolvable:$true] %s40_s23 }
   0x6   :  { %s42_s25 = sshll.u32 %s1104_s24, 4  ;;  %s59_s28 = sshll.u32 %s1435_s9, 4  ;;  %s43_s25 = int_to_ptr.vmem [resolvable:$true] %s42_s25  ;;  %s60_s28 = int_to_ptr.hbm [resolvable:$true] %s59_s28 }
   0x7   :  { %s1105_s29 = smov 64   ;;  %s1106_s30 = smov 4  }
   0x8   :  { %48 = dma.hbm_to_vmem [thread:$0]  %s41_s23, 256, %s43_s25, [#allocation3], %s1105_s29, %s1105_s29, %s1106_s30  }
   0x9   :  { %s1107_s0 = smov [#allocation5]  }
   0xa   :  { %s61_s17 = sshll.u32 %s1107_s0, 4  ;;  %s62_s17 = int_to_ptr.vmem [resolvable:$true] %s61_s17 }
   0xb   :  { %67 = dma.hbm_to_vmem [thread:$0]  %s60_s28, 256, %s62_s17, [#allocation6], %s1105_s29, %s1105_s29, %s1106_s30  }
   0xc   :  { %1096 = dma.done.wait [#allocation3], 256  }
   0xd   :  { %1097 = vsyncadd [#allocation3], 4294967040 }
   0xe   :  { %1098 = dma.done.wait [#allocation6], 256  }
   0xf   :  { %1099 = vsyncadd [#allocation6], 4294967040  ;;  %vm91_vm0 = vcmask 261120   ;;  %s1445_s19 = sld [smem:[#allocation14_spill]]  ;;  %v1108_v4 = vmov 32.0   ;;  %v887_v21 = vld [vmem:[%s1429_s3 + $0x8] sm:$0xff] }
  0x10   :  { %958 = vrcp.f32 %v1108_v4  ;;  %183 = vmatpush.bf16.msra.mxu0 %v887_v21  ;;  %v886_v23 = vld [vmem:[%s1429_s3] sm:$0xff]  ;;  %s1111_s30 = smov 80   ;;  %s1112_s0 = smov 120   ;;  %vm235_vm8 = vcmask 64512   ;;  %vm289_vm9 = vcmask 523264   ;;  %vm532_vm10 = vcmask 130048  }
  0x11   :  { %v950_v42 = vld [vmem:[%s1427_s1] ss:$0 sm:$0xff]  ;;  %s1109_s1 = smov 104   ;;  %s1115_s18 = smov 16   ;;  %vm535_vm11 = vcmask 195584  }
  0x12   :  { %v951_v47 = vld [vmem:[%s1428_s2] ss:$0 sm:$0xff]  ;;  %s1110_s2 = smov 56   ;;  %s1118_s21 = smov 128  }
  0x13   :  { %v952_v53 = vld [vmem:[%s1430_s4] ss:$0 sm:$0xff]  ;;  %s1113_s4 = smov 112   ;;  %s1119_s23 = smov [#allocation7]  }
  0x14   :  { %184 = vmatpush.bf16.msra.mxu0 %v886_v23  ;;  %v216_v23 = vld [vmem:[%s1439_s13 + $0x8] sm:$0xff]  ;;  %s765_s24 = sshll.u32 %s1119_s23, 4  ;;  %s766_s24 = int_to_ptr.vmem [resolvable:$true] %s765_s24 }
  0x15   :  { %v1214_v0 = vld [vmem:[%s1445_s19] sm:$0xff]  ;;  %v1221_v2 = vld [vmem:[%s1445_s19 + $0x8] sm:$0xff]  ;;  %s1116_s19 = smov 24  }
  0x16   :  { %v92_v1 = vsel %vm91_vm0, %v1214_v0, 0.0  ;;  %v95_v3 = vsel %vm91_vm0, %v1221_v2, 0.0  ;;  %v959_v5 = vpop.eup %958 }
  0x17   :  { %93 = vadd.xlane.f32.xlu0 %v92_v1  ;;  %v99_v6 = vmul.f32 32.0, %v959_v5  ;;  %vm103_vm1 = vweird.f32 %v959_v5 }
  0x19   :  { %v100_v7 = vsub.f32 1.0, %v99_v6 }
  0x1b   :  { %v101_v8 = vmul.f32 %v959_v5, %v100_v7 }
  0x1d   :  { %v102_v9 = vadd.f32 %v959_v5, %v101_v8 }
  0x1f   :  { %96 = vadd.xlane.f32.xlu0 %v95_v3  ;;  %v1225_v10 = vsel %vm103_vm1, %v959_v5, %v102_v9 }
  0x8a   :  { %v94_v11 = vpop.xlane.xlu0 %93 }
  0x8b   :  { %v105_v12 = vmul.f32 %v1225_v10, %v94_v11 }
  0x8d   :  { %v107_v13 = vsub.f32 %v1214_v0, %v105_v12 }
  0x8f   :  { %v109_v14 = vmul.f32 %v107_v13, %v107_v13 }
  0x91   :  { %v111_v15 = vsel %vm91_vm0, %v109_v14, 0.0 }
  0x92   :  { %112 = vadd.xlane.f32.xlu1 %v111_v15  ;;  %v97_v16 = vpop.xlane.xlu0 %96 }
  0x93   :  { %v106_v17 = vmul.f32 %v1225_v10, %v97_v16 }
  0x95   :  { %v108_v18 = vsub.f32 %v1221_v2, %v106_v17 }
  0x97   :  { %v110_v19 = vmul.f32 %v108_v18, %v108_v18 }
  0x99   :  { %v114_v20 = vsel %vm91_vm0, %v110_v19, 0.0  ;;  %v215_v19 = vld [vmem:[%s1439_s13] sm:$0xff] }
  0x9a   :  { %115 = vadd.xlane.f32.xlu1 %v114_v20 }
 0x105   :  { %v113_v22 = vpop.xlane.xlu1 %112 }
 0x106   :  { %v117_v24 = vmul.f32 %v113_v22, %v1225_v10 }
 0x108   :  { %v119_v25 = vadd.f32 1e-05, %v117_v24 }
 0x10a   :  { %960 = vrsqrt.f32 %v119_v25  ;;  %vm127_vm3 = vweird.f32 %v119_v25 }
 0x10d   :  { %v116_v26 = vpop.xlane.xlu1 %115 }
 0x10e   :  { %v118_v27 = vmul.f32 %v116_v26, %v1225_v10 }
 0x110   :  { %v961_v28 = vpop.eup %960  ;;  %v120_v29 = vadd.f32 1e-05, %v118_v27  ;;  %v217_v27 = vld [vmem:[%s1439_s13 + $0x10] sm:$0xff] }
 0x111   :  { %v122_v30 = vmul.f32 %v961_v28, %v119_v25  ;;  %vm128_vm2 = vweird.f32 %v961_v28 }
 0x112   :  { %962 = vrsqrt.f32 %v120_v29  ;;  %vm129_vm4 = vmor %vm127_vm3, %vm128_vm2  ;;  %vm137_vm6 = vweird.f32 %v120_v29 }
 0x113   :  { %v123_v31 = vmul.f32 %v961_v28, %v122_v30 }
 0x115   :  { %v124_v32 = vmul.f32 0.5, %v123_v31  ;;  %v218_v31 = vld [vmem:[%s1439_s13 + $0x18] sm:$0xff] }
 0x117   :  { %v125_v33 = vsub.f32 1.5, %v124_v32 }
 0x118   :  { %v963_v34 = vpop.eup %962 }
 0x119   :  { %v126_v35 = vmul.f32 %v961_v28, %v125_v33  ;;  %v132_v36 = vmul.f32 %v963_v34, %v120_v29  ;;  %vm138_vm5 = vweird.f32 %v963_v34 }
 0x11a   :  { %vm139_vm7 = vmor %vm137_vm6, %vm138_vm5 }
 0x11b   :  { %v133_v37 = vmul.f32 %v963_v34, %v132_v36  ;;  %v130_v38 = vsel %vm129_vm4, %v961_v28, %v126_v35  ;;  %v219_v35 = vld [vmem:[%s1439_s13 + $0x20] sm:$0xff] }
 0x11c   :  { %v141_v41 = vmul.f32 %v130_v38, %v107_v13 }
 0x11d   :  { %v134_v39 = vmul.f32 0.5, %v133_v37 }
 0x11e   :  { %v146_v46 = vmul.f32 %v950_v42, %v141_v41 }
 0x11f   :  { %v135_v40 = vsub.f32 1.5, %v134_v39  ;;  %v220_v39 = vld [vmem:[%s1439_s13 + $0x28] sm:$0xff] }
 0x120   :  { %v151_v49 = vadd.f32 %v951_v47, %v146_v46 }
 0x121   :  { %v136_v43 = vmul.f32 %v963_v34, %v135_v40 }
 0x123   :  { %v140_v44 = vsel %vm139_vm7, %v963_v34, %v136_v43  ;;  %v221_v43 = vld [vmem:[%s1439_s13 + $0x30] sm:$0xff] }
 0x124   :  { %v142_v45 = vmul.f32 %v140_v44, %v108_v18 }
 0x126   :  { %v147_v48 = vmul.f32 %v950_v42, %v142_v45 }
 0x128   :  { %v152_v50 = vadd.f32 %v951_v47, %v147_v48  ;;  %v222_v47 = vld [vmem:[%s1439_s13 + $0x38] sm:$0xff] }
 0x12a   :  { %v153_v51 = vpack.c.bf16 %v152_v50, %v151_v49 }
 0x12c   :  { %807 = vmatmul.msk.bf16.vlgmr.msra.gmra.mxu0 %vm91_vm0, %v153_v51 }
 0x1a9   :  { %v186_v52 = vpop.f32.mrf.mxu0 }
 0x1aa   :  { %v187_v55 = vadd.f32 %v952_v53, %v186_v52 }
 0x1b1   :  { %v188_v54 = vpop.f32.mrf.mxu0 }
 0x1b2   :  { %v189_v56 = vadd.f32 %v952_v53, %v188_v54 }
 0x1b4   :  { %v930_v57 = vpack.i.bf16 %v189_v56, %v187_v55  ;;  %v1251_v58 = vpack.c.bf16 %v189_v56, %v187_v55 }
 0x1b6   :  { %931 = vrot.lane.b32.xlu0 %v930_v57, %s1109_s1  ;;  %921 = vrot.lane.b32.xlu2 %v930_v57, %s1110_s2 }
 0x1be   :  { %926 = vrot.lane.b32.xlu2 %v930_v57, %s1111_s30 }
 0x210   :  { %v922_v59 = vpop.permute.xlu2 %921 }
 0x211   :  { %v924_v60 = vunpack.i.h.bf16 %v922_v59  ;;  %v923_v61 = vunpack.i.l.bf16 %v922_v59 }
 0x213   :  { %v214_v62 = vpack.c.bf16 %v924_v60, %v923_v61 }
 0x215   :  { %233 = vrot.lane.b32.xlu1 %v214_v62, %s1112_s0 }
 0x218   :  { %v927_v63 = vpop.permute.xlu2 %926 }
 0x219   :  { %v929_v1 = vunpack.i.h.bf16 %v927_v63  ;;  %v928_v3 = vunpack.i.l.bf16 %v927_v63 }
 0x21b   :  { %v1253_v4 = vpack.c.bf16 %v929_v1, %v928_v3 }
 0x21d   :  { %231 = vrot.lane.b32.xlu2 %v1253_v4, %s1112_s0  ;;  %388 = vrot.lane.b32.xlu1 %v214_v62, %s1113_s4 }
 0x228   :  { %v932_v5 = vpop.permute.xlu0 %931 }
 0x229   :  { %v934_v6 = vunpack.i.h.bf16 %v932_v5  ;;  %v933_v7 = vunpack.i.l.bf16 %v932_v5 }
 0x22b   :  { %v1257_v8 = vpack.c.bf16 %v934_v6, %v933_v7 }
 0x22d   :  { %229 = vrot.lane.b32.xlu2 %v1257_v8, %s1112_s0 }
 0x235   :  { %227 = vrot.lane.b32.xlu2 %v1251_v58, %s1112_s0 }
 0x277   :  { %v232_v12 = vpop.permute.xlu2 %231 }
 0x278   :  { %v255_v14 = vsel %vm235_vm8, %v232_v12, 0 }
 0x287   :  { %v234_v9 = vpop.permute.xlu1 %233  ;;  %v230_v15 = vpop.permute.xlu2 %229 }
 0x288   :  { %v258_v11 = vsel %vm235_vm8, %v234_v9, 0  ;;  %v252_v16 = vsel %vm235_vm8, %v230_v15, 0 }
 0x289   :  { %264 = vmatpush.bf16.xpose.msra.mxu1 %v258_v11 }
 0x28f   :  { %v389_v13 = vpop.permute.xlu1 %388  ;;  %v228_v17 = vpop.permute.xlu2 %227 }
 0x290   :  { %410 = vmatpush.bf16.msra.mxu2 %v389_v13  ;;  %v249_v18 = vsel %vm235_vm8, %v228_v17, 0 }
 0x291   :  { %265 = vmatpush.bf16.xpose.msra.mxu1 %v255_v14 }
 0x299   :  { %266 = vmatpush.bf16.xpose.msra.mxu1 %v252_v16 }
 0x2a1   :  { %267 = vmatpush.bf16.xpose.msra.mxu1 %v249_v18 }
 0x2a8   :  { %808 = vmatmul.msk.bf16.vlgmr.msra.gmra.mxu1 %vm235_vm8, %v1251_v58 }
 0x2b8   :  { %809 = vmatmul.msk.bf16.gmra.mxu1 %vm235_vm8, %v1257_v8 }
 0x2c8   :  { %810 = vmatmul.msk.bf16.gmra.mxu1 %vm235_vm8, %v1253_v4 }
 0x2d8   :  { %811 = vmatmul.msk.bf16.gmra.mxu1 %vm235_vm8, %v214_v62 }
 0x325   :  { %v269_v20 = vpop.f32.mrf.mxu1 }
 0x326   :  { %v270_v21 = vadd.f32 %v269_v20, %v215_v19 }
 0x328   :  { %v290_v22 = vsel %vm289_vm9, %v270_v21, -inf }
 0x329   :  { %291 = vmax.xlane.f32.xlu0 %v290_v22 }
 0x32d   :  { %v271_v24 = vpop.f32.mrf.mxu1 }
 0x32e   :  { %v272_v25 = vadd.f32 %v271_v24, %v216_v23 }
 0x330   :  { %v293_v26 = vsel %vm289_vm9, %v272_v25, -inf }
 0x331   :  { %294 = vmax.xlane.f32.xlu2 %v293_v26 }
 0x335   :  { %v274_v28 = vpop.f32.mrf.mxu1 }
 0x336   :  { %v275_v29 = vadd.f32 %v274_v28, %v217_v27 }
 0x338   :  { %v296_v30 = vsel %vm289_vm9, %v275_v29, -inf }
 0x339   :  { %297 = vmax.xlane.f32.xlu1 %v296_v30  ;;  %v891_v30 = vld [vmem:[%s1440_s14 + $0x18] sm:$0xff] }
 0x33a   :  { %471 = vmatpush.bf16.msra.mxu3 %v891_v30 }
 0x33d   :  { %v276_v32 = vpop.f32.mrf.mxu1 }
 0x33e   :  { %v277_v33 = vadd.f32 %v276_v32, %v218_v31  ;;  %v890_v31 = vld [vmem:[%s1440_s14 + $0x10] sm:$0xff]  ;;  %v889_v32 = vld [vmem:[%s1440_s14 + $0x8] sm:$0xff] }
 0x33f   :  { %472 = vmatpush.bf16.msra.mxu3 %v890_v31  ;;  %v893_v31 = vld [vmem:[#allocation2 + $0x8] sm:$0xff] }
 0x340   :  { %v299_v34 = vsel %vm289_vm9, %v277_v33, -inf  ;;  %568 = vmatpush.bf16.msrb.mxu0 %v893_v31 }
 0x341   :  { %300 = vmax.xlane.f32.xlu0 %v299_v34 }
 0x343   :  { %473 = vmatpush.bf16.msra.mxu3 %v889_v32  ;;  %v892_v32 = vld [vmem:[#allocation2] sm:$0xff] }
 0x344   :  { %569 = vmatpush.bf16.msrb.mxu0 %v892_v32  ;;  %v955_v32 = vld [vmem:[%s1434_s8] ss:$0 sm:$0xff] }
 0x345   :  { %v279_v36 = vpop.f32.mrf.mxu1 }
 0x346   :  { %v280_v37 = vadd.f32 %v279_v36, %v219_v35 }
 0x348   :  { %v302_v38 = vsel %vm289_vm9, %v280_v37, -inf }
 0x349   :  { %303 = vmax.xlane.f32.xlu2 %v302_v38 }
 0x34d   :  { %v281_v40 = vpop.f32.mrf.mxu1 }
 0x34e   :  { %v282_v41 = vadd.f32 %v281_v40, %v220_v39 }
 0x350   :  { %v305_v42 = vsel %vm289_vm9, %v282_v41, -inf }
 0x351   :  { %306 = vmax.xlane.f32.xlu1 %v305_v42 }
 0x355   :  { %v284_v44 = vpop.f32.mrf.mxu1 }
 0x356   :  { %v285_v45 = vadd.f32 %v284_v44, %v221_v43 }
 0x358   :  { %v308_v46 = vsel %vm289_vm9, %v285_v45, -inf }
 0x359   :  { %309 = vmax.xlane.f32.xlu0 %v308_v46 }
 0x35d   :  { %v286_v48 = vpop.f32.mrf.mxu1 }
 0x35e   :  { %v287_v49 = vadd.f32 %v286_v48, %v222_v47 }
 0x360   :  { %v311_v50 = vsel %vm289_vm9, %v287_v49, -inf }
 0x361   :  { %312 = vmax.xlane.f32.xlu2 %v311_v50 }
 0x36a   :  { %382 = vrot.lane.b32.xlu1 %v1251_v58, %s1113_s4 }
 0x39c   :  { %v292_v51 = vpop.xlane.xlu0 %291 }
 0x39d   :  { %v314_v52 = vsub.f32 %v270_v21, %v292_v51 }
 0x39f   :  { %v322_v53 = vmul.f32 1.442695, %v314_v52 }
 0x3a1   :  { %964 = vpow2.f32 %v322_v53 }
 0x3a4   :  { %v295_v54 = vpop.xlane.xlu2 %294 }
 0x3a5   :  { %v315_v55 = vsub.f32 %v272_v25, %v295_v54 }
 0x3a7   :  { %v1306_v56 = vpop.eup %964  ;;  %v324_v57 = vmul.f32 1.442695, %v315_v55 }
 0x3a8   :  { %v338_v59 = vsel %vm289_vm9, %v1306_v56, 0.0 }
 0x3a9   :  { %966 = vpow2.f32 %v324_v57  ;;  %339 = vadd.xlane.f32.xlu0 %v338_v59 }
 0x3ac   :  { %v298_v9 = vpop.xlane.xlu1 %297 }
 0x3ad   :  { %v316_v11 = vsub.f32 %v275_v29, %v298_v9 }
 0x3af   :  { %v967_v60 = vpop.eup %966  ;;  %v326_v13 = vmul.f32 1.442695, %v316_v11 }
 0x3b0   :  { %v341_v61 = vsel %vm289_vm9, %v967_v60, 0.0 }
 0x3b1   :  { %342 = vadd.xlane.f32.xlu2 %v341_v61 }
 0x3b4   :  { %v301_v62 = vpop.xlane.xlu0 %300 }
 0x3b5   :  { %v317_v58 = vsub.f32 %v277_v33, %v301_v62  ;;  %v888_v33 = vld [vmem:[%s1440_s14] sm:$0xff]  ;;  %s1114_s14 = smov 8  }
 0x3b6   :  { %474 = vmatpush.bf16.msra.mxu3 %v888_v33 }
 0x3b7   :  { %v328_v63 = vmul.f32 1.442695, %v317_v58 }
 0x3b9   :  { %968 = vpow2.f32 %v328_v63 }
 0x3bc   :  { %v304_v15 = vpop.xlane.xlu2 %303 }
 0x3bd   :  { %386 = vrot.lane.b32.xlu0 %v1253_v4, %s1113_s4  ;;  %v318_v17 = vsub.f32 %v280_v37, %v304_v15 }
 0x3bf   :  { %v1313_v1 = vpop.eup %968  ;;  %v330_v19 = vmul.f32 1.442695, %v318_v17 }
 0x3c0   :  { %v347_v3 = vsel %vm289_vm9, %v1313_v1, 0.0 }
 0x3c1   :  { %348 = vadd.xlane.f32.xlu1 %v347_v3 }
 0x3c4   :  { %v307_v14 = vpop.xlane.xlu1 %306 }
 0x3c5   :  { %v319_v16 = vsub.f32 %v282_v41, %v307_v14 }
 0x3c7   :  { %v332_v18 = vmul.f32 1.442695, %v319_v16 }
 0x3c9   :  { %384 = vrot.lane.b32.xlu2 %v1257_v8, %s1113_s4 }
 0x3cc   :  { %v310_v5 = vpop.xlane.xlu0 %309 }
 0x3cd   :  { %v320_v6 = vsub.f32 %v285_v45, %v310_v5 }
 0x3cf   :  { %v334_v7 = vmul.f32 1.442695, %v320_v6 }
 0x3d1   :  { %970 = vpow2.f32 %v334_v7 }
 0x3d2   :  { %972 = vpow2.f32 %v326_v13 }
 0x3d3   :  { %974 = vpow2.f32 %v332_v18 }
 0x3d4   :  { %v313_v20 = vpop.xlane.xlu2 %312  ;;  %976 = vpow2.f32 %v330_v19 }
 0x3d5   :  { %v321_v22 = vsub.f32 %v287_v49, %v313_v20 }
 0x3d7   :  { %v1319_v12 = vpop.eup %970  ;;  %v336_v24 = vmul.f32 1.442695, %v321_v22 }
 0x3d8   :  { %v356_v4 = vsel %vm289_vm9, %v1319_v12, 0.0  ;;  %v973_v8 = vpop.eup %972 }
 0x3d9   :  { %357 = vadd.xlane.f32.xlu1 %v356_v4  ;;  %v344_v21 = vsel %vm289_vm9, %v973_v8, 0.0  ;;  %v975_v23 = vpop.eup %974  ;;  %978 = vpow2.f32 %v336_v24 }
 0x3da   :  { %v977_v25 = vpop.eup %976  ;;  %v353_v26 = vsel %vm289_vm9, %v975_v23, 0.0 }
 0x3db   :  { %v350_v27 = vsel %vm289_vm9, %v977_v25, 0.0 }
 0x3dc   :  { %v383_v43 = vpop.permute.xlu1 %382 }
 0x3df   :  { %v979_v28 = vpop.eup %978 }
 0x3e0   :  { %v359_v29 = vsel %vm289_vm9, %v979_v28, 0.0 }
 0x3e7   :  { %345 = vadd.xlane.f32.xlu0 %v344_v21 }
 0x3ef   :  { %354 = vadd.xlane.f32.xlu0 %v353_v26 }
 0x3f2   :  { %351 = vadd.xlane.f32.xlu2 %v350_v27 }
 0x3fa   :  { %360 = vadd.xlane.f32.xlu2 %v359_v29 }
 0x41c   :  { %v340_v34 = vpop.xlane.xlu0 %339 }
 0x41d   :  { %980 = vrcp.f32 %v340_v34 }
 0x423   :  { %v981_v36 = vpop.eup %980 }
 0x424   :  { %v343_v35 = vpop.xlane.xlu2 %342  ;;  %v370_v38 = vmul.f32 %v981_v36, %v1306_v56 }
 0x425   :  { %982 = vrcp.f32 %v343_v35 }
 0x42b   :  { %v983_v37 = vpop.eup %982 }
 0x42c   :  { %v371_v39 = vmul.f32 %v983_v37, %v967_v60  ;;  %v385_v42 = vpop.permute.xlu2 %384 }
 0x42e   :  { %v378_v40 = vpack.c.bf16 %v371_v39, %v370_v38 }
 0x42f   :  { %v387_v41 = vpop.permute.xlu0 %386 }
 0x430   :  { %411 = vmatpush.bf16.msra.mxu2 %v387_v41  ;;  %832 = vmatmul.msk.bf16.vlgmr.msra.gmra.mxu3 %vm289_vm9, %v378_v40 }
 0x434   :  { %412 = vmatpush.bf16.msra.mxu2 %v385_v42  ;;  %v349_v44 = vpop.xlane.xlu1 %348 }
 0x435   :  { %984 = vrcp.f32 %v349_v44 }
 0x438   :  { %413 = vmatpush.bf16.msra.mxu2 %v383_v43 }
 0x43b   :  { %812 = vmatmul.msk.bf16.vlgmr.msra.gmra.mxu2 %vm289_vm9, %v378_v40  ;;  %v985_v46 = vpop.eup %984 }
 0x43c   :  { %v373_v49 = vmul.f32 %v985_v46, %v1313_v1 }
 0x44c   :  { %v358_v60 = vpop.xlane.xlu1 %357 }
 0x45a   :  { %v346_v45 = vpop.xlane.xlu0 %345 }
 0x45b   :  { %986 = vrcp.f32 %v346_v45 }
 0x461   :  { %v987_v47 = vpop.eup %986 }
 0x462   :  { %v372_v48 = vmul.f32 %v987_v47, %v973_v8  ;;  %v355_v52 = vpop.xlane.xlu0 %354 }
 0x464   :  { %v379_v50 = vpack.c.bf16 %v373_v49, %v372_v48  ;;  %v953_v49 = vld [vmem:[%s1432_s6] ss:$0 sm:$0xff] }
 0x465   :  { %v352_v51 = vpop.xlane.xlu2 %351 }
 0x466   :  { %813 = vmatmul.msk.bf16.gmra.mxu2 %vm289_vm9, %v379_v50  ;;  %833 = vmatmul.msk.bf16.gmra.mxu3 %vm289_vm9, %v379_v50  ;;  %988 = vrcp.f32 %v352_v51 }
 0x467   :  { %990 = vrcp.f32 %v355_v52 }
 0x46c   :  { %v989_v53 = vpop.eup %988 }
 0x46d   :  { %v991_v54 = vpop.eup %990  ;;  %v374_v55 = vmul.f32 %v989_v53, %v977_v25  ;;  %v361_v57 = vpop.xlane.xlu2 %360 }
 0x46e   :  { %v375_v56 = vmul.f32 %v991_v54, %v975_v23  ;;  %992 = vrcp.f32 %v361_v57 }
 0x46f   :  { %994 = vrcp.f32 %v358_v60 }
 0x470   :  { %v380_v59 = vpack.c.bf16 %v375_v56, %v374_v55 }
 0x474   :  { %v993_v61 = vpop.eup %992 }
 0x475   :  { %v995_v62 = vpop.eup %994  ;;  %v377_v58 = vmul.f32 %v993_v61, %v979_v28 }
 0x476   :  { %814 = vmatmul.msk.bf16.gmra.mxu2 %vm289_vm9, %v380_v59  ;;  %834 = vmatmul.msk.bf16.gmra.mxu3 %vm289_vm9, %v380_v59  ;;  %v376_v63 = vmul.f32 %v995_v62, %v1319_v12 }
 0x478   :  { %v381_v1 = vpack.c.bf16 %v377_v58, %v376_v63 }
 0x486   :  { %815 = vmatmul.msk.bf16.gmra.mxu2 %vm289_vm9, %v381_v1  ;;  %835 = vmatmul.msk.bf16.gmra.mxu3 %vm289_vm9, %v381_v1 }
 0x4b3   :  { %v476_v3 = vpop.f32.mrf.mxu3 }
 0x4bb   :  { %v478_v6 = vpop.f32.mrf.mxu3 }
 0x4be   :  { %v415_v5 = vpop.f32.mrf.mxu2 }
 0x4c6   :  { %v417_v7 = vpop.f32.mrf.mxu2 }
 0x4e9   :  { %v420_v9 = vpop.f32.mrf.mxu2  ;;  %v481_v11 = vpop.f32.mrf.mxu3 }
 0x4ea   :  { %v496_v8 = vadd.f32 %v481_v11, %v476_v3 }
 0x4f1   :  { %v422_v4 = vpop.f32.mrf.mxu2  ;;  %v483_v13 = vpop.f32.mrf.mxu3 }
 0x4f2   :  { %v935_v14 = vpack.i.bf16 %v422_v4, %v420_v9  ;;  %v497_v24 = vadd.f32 %v483_v13, %v478_v6  ;;  %v894_v9 = vld [vmem:[#allocation5] sm:$0xff]  ;;  %v903_v4 = vld [vmem:[%s1437_s11 + $0x38] sm:$0xff] }
 0x4f4   :  { %936 = vrot.lane.b32.xlu0 %v935_v14, %s1114_s14 }
 0x4f9   :  { %v425_v15 = vpop.f32.mrf.mxu2  ;;  %v486_v16 = vpop.f32.mrf.mxu3 }
 0x4fa   :  { %v498_v19 = vadd.f32 %v496_v8, %v486_v16 }
 0x501   :  { %v427_v12 = vpop.f32.mrf.mxu2  ;;  %v488_v17 = vpop.f32.mrf.mxu3 }
 0x502   :  { %v940_v18 = vpack.i.bf16 %v427_v12, %v425_v15  ;;  %v499_v25 = vadd.f32 %v497_v24, %v488_v17  ;;  %v902_v15 = vld [vmem:[%s1437_s11 + $0x30] sm:$0xff] }
 0x504   :  { %941 = vrot.lane.b32.xlu1 %v940_v18, %s1115_s18  ;;  %v901_v18 = vld [vmem:[%s1437_s11 + $0x28] sm:$0xff] }
 0x509   :  { %v430_v20 = vpop.f32.mrf.mxu2  ;;  %v491_v21 = vpop.f32.mrf.mxu3 }
 0x50a   :  { %v500_v22 = vadd.f32 %v498_v19, %v491_v21 }
 0x50c   :  { %v502_v23 = vmul.f32 0.25, %v500_v22 }
 0x50e   :  { %504 = vst.msk [vmem:[#allocation8] sm:$0xff] %vm235_vm8, %v502_v23 }
 0x511   :  { %v432_v26 = vpop.f32.mrf.mxu2  ;;  %v493_v27 = vpop.f32.mrf.mxu3 }
 0x512   :  { %v945_v28 = vpack.i.bf16 %v432_v26, %v430_v20  ;;  %v501_v29 = vadd.f32 %v499_v25, %v493_v27 }
 0x514   :  { %v503_v30 = vmul.f32 0.25, %v501_v29  ;;  %946 = vrot.lane.b32.xlu2 %v945_v28, %s1116_s19  ;;  %v954_v28 = vld [vmem:[%s1433_s7] ss:$0 sm:$0xff]  ;;  %s1117_s19 = smov [#allocation8]  }
 0x515   :  { %s778_s9 = sshll.u32 %s1117_s19, 4  ;;  %s779_s9 = int_to_ptr.vmem [resolvable:$true] %s778_s9 }
 0x516   :  { %505 = vst.msk [vmem:[#allocation8 + $0x8] sm:$0xff] %vm235_vm8, %v503_v30 }
 0x566   :  { %v937_v33 = vpop.permute.xlu0 %936 }
 0x567   :  { %v939_v34 = vunpack.i.h.bf16 %v937_v33  ;;  %v938_v35 = vunpack.i.l.bf16 %v937_v33 }
 0x569   :  { %v531_v40 = vsel %vm235_vm8, %v417_v7, %v939_v34  ;;  %v530_v41 = vsel %vm235_vm8, %v415_v5, %v938_v35  ;;  %v895_v5 = vld [vmem:[#allocation5 + $0x8] sm:$0xff] }
 0x56a   :  { %664 = vmatpush.bf16.msra.mxu0 %v895_v5 }
 0x56e   :  { %v947_v36 = vpop.permute.xlu2 %946  ;;  %665 = vmatpush.bf16.msra.mxu0 %v894_v9 }
 0x56f   :  { %v949_v42 = vunpack.i.h.bf16 %v947_v36  ;;  %v948_v43 = vunpack.i.l.bf16 %v947_v36 }
 0x576   :  { %v942_v37 = vpop.permute.xlu1 %941 }
 0x577   :  { %v944_v38 = vunpack.i.h.bf16 %v942_v37  ;;  %v943_v39 = vunpack.i.l.bf16 %v942_v37 }
 0x579   :  { %v533_v44 = vsel %vm532_vm10, %v530_v41, %v943_v39  ;;  %v534_v45 = vsel %vm532_vm10, %v531_v40, %v944_v38  ;;  %v899_v39 = vld [vmem:[%s1437_s11 + $0x18] sm:$0xff]  ;;  %v898_v40 = vld [vmem:[%s1437_s11 + $0x10] sm:$0xff]  ;;  %v897_v41 = vld [vmem:[%s1437_s11 + $0x8] sm:$0xff] }
 0x57a   :  { %v536_v46 = vsel %vm535_vm11, %v533_v44, %v948_v43  ;;  %v537_v47 = vsel %vm535_vm11, %v534_v45, %v949_v42  ;;  %v896_v42 = vld [vmem:[%s1437_s11] sm:$0xff] }
 0x57b   :  { %v538_v48 = vpack.c.bf16 %v537_v47, %v536_v46  ;;  %v956_v44 = vld [vmem:[%s1436_s10] ss:$0 sm:$0xff] }
 0x57d   :  { %844 = vmatmul.msk.bf16.vlgmr.msrb.gmra.mxu0 %vm91_vm0, %v538_v48 }
 0x57e   :  { %743 = vmatpush.bf16.msrb.mxu0 %v903_v4 }
 0x582   :  { %744 = vmatpush.bf16.msrb.mxu0 %v902_v15 }
 0x586   :  { %745 = vmatpush.bf16.msrb.mxu0 %v901_v18 }
 0x5fa   :  { %v571_v50 = vpop.f32.mrf.mxu0 }
 0x5fb   :  { %v572_v51 = vadd.f32 %v953_v49, %v571_v50 }
 0x5fd   :  { %v1360_v52 = vadd.f32 %v572_v51, %v1214_v0  ;;  %v957_v51 = vld [vmem:[%s1438_s12] ss:$0 sm:$0xff] }
 0x5ff   :  { %v580_v53 = vsel %vm91_vm0, %v1360_v52, 0.0 }
 0x600   :  { %581 = vadd.xlane.f32.xlu0 %v580_v53 }
 0x602   :  { %v573_v54 = vpop.f32.mrf.mxu0 }
 0x603   :  { %v574_v55 = vadd.f32 %v953_v49, %v573_v54 }
 0x605   :  { %v1365_v56 = vadd.f32 %v574_v55, %v1221_v2 }
 0x607   :  { %v583_v57 = vsel %vm91_vm0, %v1365_v56, 0.0 }
 0x608   :  { %584 = vadd.xlane.f32.xlu1 %v583_v57 }
 0x673   :  { %v582_v59 = vpop.xlane.xlu0 %581 }
 0x674   :  { %v586_v60 = vmul.f32 %v582_v59, %v1225_v10 }
 0x676   :  { %v588_v61 = vsub.f32 %v1360_v52, %v586_v60 }
 0x678   :  { %v590_v0 = vmul.f32 %v588_v61, %v588_v61 }
 0x67a   :  { %v592_v62 = vsel %vm91_vm0, %v590_v0, 0.0 }
 0x67b   :  { %v585_v58 = vpop.xlane.xlu1 %584  ;;  %593 = vadd.xlane.f32.xlu2 %v592_v62 }
 0x67c   :  { %v587_v63 = vmul.f32 %v585_v58, %v1225_v10 }
 0x67e   :  { %v589_v1 = vsub.f32 %v1365_v56, %v587_v63 }
 0x680   :  { %v591_v2 = vmul.f32 %v589_v1, %v589_v1 }
 0x682   :  { %v595_v3 = vsel %vm91_vm0, %v591_v2, 0.0 }
 0x683   :  { %596 = vadd.xlane.f32.xlu0 %v595_v3 }
 0x6ee   :  { %v594_v6 = vpop.xlane.xlu2 %593 }
 0x6ef   :  { %v598_v7 = vmul.f32 %v594_v6, %v1225_v10 }
 0x6f1   :  { %v600_v11 = vadd.f32 1e-05, %v598_v7 }
 0x6f3   :  { %996 = vrsqrt.f32 %v600_v11  ;;  %vm608_vm13 = vweird.f32 %v600_v11 }
 0x6f6   :  { %v597_v13 = vpop.xlane.xlu0 %596 }
 0x6f7   :  { %v599_v14 = vmul.f32 %v597_v13, %v1225_v10  ;;  %v900_v10 = vld [vmem:[%s1437_s11 + $0x20] sm:$0xff]  ;;  %s780_s11 = sshll.u32 %s1442_s16, 4  ;;  %s767_s16 = sshll.u32 %s1441_s15, 4  ;;  %s781_s11 = int_to_ptr.hbm [resolvable:$true] %s780_s11  ;;  %s768_s16 = int_to_ptr.hbm [resolvable:$true] %s767_s16 }
 0x6f8   :  { %746 = vmatpush.bf16.msrb.mxu0 %v900_v10  ;;  %786 = dma.vmem_to_hbm [thread:$0]  %s779_s9, 256, %s781_s11, [#allocation9], %s1118_s21, %s1118_s21, %s1114_s14  }
 0x6f9   :  { %v997_v16 = vpop.eup %996  ;;  %v601_v12 = vadd.f32 1e-05, %v599_v14 }
 0x6fa   :  { %v603_v17 = vmul.f32 %v997_v16, %v600_v11  ;;  %vm609_vm12 = vweird.f32 %v997_v16 }
 0x6fb   :  { %998 = vrsqrt.f32 %v601_v12  ;;  %vm610_vm14 = vmor %vm608_vm13, %vm609_vm12  ;;  %vm618_vm1 = vweird.f32 %v601_v12 }
 0x6fc   :  { %v604_v8 = vmul.f32 %v997_v16, %v603_v17  ;;  %747 = vmatpush.bf16.msrb.mxu0 %v899_v39 }
 0x6fe   :  { %v605_v19 = vmul.f32 0.5, %v604_v8 }
 0x700   :  { %v606_v20 = vsub.f32 1.5, %v605_v19  ;;  %748 = vmatpush.bf16.msrb.mxu0 %v898_v40 }
 0x701   :  { %v999_v21 = vpop.eup %998 }
 0x702   :  { %v607_v22 = vmul.f32 %v997_v16, %v606_v20  ;;  %v613_v23 = vmul.f32 %v999_v21, %v601_v12  ;;  %vm619_vm15 = vweird.f32 %v999_v21 }
 0x703   :  { %vm620_vm2 = vmor %vm618_vm1, %vm619_vm15 }
 0x704   :  { %v614_v24 = vmul.f32 %v999_v21, %v613_v23  ;;  %v611_v25 = vsel %vm610_vm14, %v997_v16, %v607_v22  ;;  %749 = vmatpush.bf16.msrb.mxu0 %v897_v41 }
 0x705   :  { %v622_v29 = vmul.f32 %v611_v25, %v588_v61 }
 0x706   :  { %v615_v26 = vmul.f32 0.5, %v614_v24 }
 0x707   :  { %v627_v33 = vmul.f32 %v954_v28, %v622_v29 }
 0x708   :  { %v616_v27 = vsub.f32 1.5, %v615_v26  ;;  %750 = vmatpush.bf16.msrb.mxu0 %v896_v42 }
 0x709   :  { %v632_v36 = vadd.f32 %v955_v32, %v627_v33 }
 0x70a   :  { %v617_v30 = vmul.f32 %v999_v21, %v616_v27 }
 0x70c   :  { %v621_v31 = vsel %vm620_vm2, %v999_v21, %v617_v30 }
 0x70d   :  { %v623_v34 = vmul.f32 %v621_v31, %v589_v1 }
 0x70f   :  { %v628_v35 = vmul.f32 %v954_v28, %v623_v34 }
 0x711   :  { %v633_v37 = vadd.f32 %v955_v32, %v628_v35 }
 0x713   :  { %v634_v38 = vpack.c.bf16 %v633_v37, %v632_v36 }
 0x715   :  { %853 = vmatmul.msk.bf16.vlgmr.msra.gmra.mxu0 %vm91_vm0, %v634_v38 }
 0x792   :  { %v667_v43 = vpop.f32.mrf.mxu0 }
 0x793   :  { %v668_v45 = vadd.f32 %v956_v44, %v667_v43 }
 0x795   :  { %v672_v48 = vmax.f32 %v668_v45, 0.0 }
 0x79a   :  { %v669_v46 = vpop.f32.mrf.mxu0 }
 0x79b   :  { %v670_v47 = vadd.f32 %v956_v44, %v669_v46 }
 0x79d   :  { %v673_v49 = vmax.f32 %v670_v47, 0.0 }
 0x79f   :  { %v674_v50 = vpack.c.bf16 %v673_v49, %v672_v48 }
 0x7a1   :  { %751 = vmatmul.bf16.vlgmr.msrb.gmra.mxu0 %v674_v50 }
 0x81e   :  { %v752_v53 = vpop.f32.mrf.mxu0 }
 0x81f   :  { %v753_v54 = vadd.f32 %v957_v51, %v752_v53 }
 0x821   :  { %v757_v55 = vadd.f32 %v753_v54, %v1360_v52 }
 0x823   :  { %759 = vst.msk [vmem:[#allocation7] sm:$0xff] %vm91_vm0, %v757_v55 }
 0x826   :  { %v754_v57 = vpop.f32.mrf.mxu0 }
 0x827   :  { %v755_v59 = vadd.f32 %v957_v51, %v754_v57 }
 0x829   :  { %v758_v60 = vadd.f32 %v755_v59, %v1365_v56 }
 0x82b   :  { %760 = vst.msk [vmem:[#allocation7 + $0x8] sm:$0xff] %vm91_vm0, %v758_v60 }
 0x82c   :  { %773 = dma.vmem_to_hbm [thread:$0]  %s766_s24, 256, %s768_s16, [#allocation4], %s1118_s21, %s1118_s21, %s1114_s14  }
 0x82d   :  { %1100 = dma.done.wait [#allocation4], 256  }
 0x82e   :  { %1101 = vsyncadd [#allocation4], 4294967040 }
 0x82f   :  { %1102 = dma.done.wait [#allocation9], 256  }
 0x830   :  { %1103 = vsyncadd [#allocation9], 4294967040 }
 0x831   :  { %795 = vsyncpa [#allocation3], 1 }
 0x832   :  { %796 = vsyncpa [#allocation6], 1 }
 0x833   :  { %797 = vsyncpa [#allocation4], 1 }
 0x834   :  { %798 = vsyncpa [#allocation9], 1 }

</bundles_post_ra>
